<compile_context>
chip_gen: v7x
topology: tpu7x:2x2x1
jax: 0.10.0
libtpu: 0.0.40
codegen_flags: <defaults>
</compile_context>

<pallas_src>
import functools

import numpy as np
import jax
import jax.numpy as jnp
from jax.experimental import pallas as pl
from jax.experimental.pallas import tpu as pltpu


# --------------------------------------------------------------------------------------
# Kernel A: head-fused feature projection + folded a_1 / a_2 projections
# --------------------------------------------------------------------------------------
def gat_projection_kernel(x_ref, w_ref, b_ref, wa_ref, ba_ref, feats_ref, scores_ref):
    x = x_ref[...]                                                         # (TM, Fin)
    feats_ref[...] = (jnp.dot(x, w_ref[...], preferred_element_type=jnp.float32)
                      + b_ref[...])                                        # (TM, k*H)
    scores_ref[...] = (jnp.dot(x, wa_ref[...], preferred_element_type=jnp.float32)
                       + ba_ref[...])                                      # (TM, 2*k)


# --------------------------------------------------------------------------------------
# Kernel B: head-fused masked row softmax over an int8 adj stripe + attn @ feats
# --------------------------------------------------------------------------------------
def gat_attention_kernel(adj_ref, a1_ref, a2_ref, feats_ref, o_ref, *, k_heads, head_dim):
    # adj stripe is shared across all heads (loaded / compared once).
    mask = adj_ref[...] != 0                                               # (TM, Npad)
    neg = jnp.float32(-1e30)
    H = head_dim

    outs = []
    for h in range(k_heads):                                               # static unroll
        a1 = a1_ref[h]                                                     # (TM, 1) sublane-major
        a2 = a2_ref[h]                                                     # (1, Npad) lane-major
        s = a1 + a2                                                        # (TM, Npad)
        s = jnp.maximum(s, jnp.float32(0.01) * s)                          # LeakyReLU
        s = jnp.where(mask, s, neg)                                        # structural mask
        m = jnp.max(s, axis=1, keepdims=True)                              # (TM, 1)
        m = jnp.where(m > jnp.float32(-1e29), m, 0.0)                      # empty/padded-row guard
        p = jnp.exp(s - m)                                                 # masked lanes -> exactly 0
        denom = jnp.sum(p, axis=1, keepdims=True)                          # (TM, 1)
        inv = 1.0 / jnp.where(denom > 0.0, denom, 1.0)                     # exact reciprocal
        feats_h = feats_ref[:, h * H:(h + 1) * H]                          # (Npad, H) resident slice
        out_h = jnp.dot(p, feats_h, preferred_element_type=jnp.float32) * inv
        outs.append(out_h)                                                 # (TM, H)

    # torch.cat(..., dim=1) slot layout; outer F.relu commutes with the concat.
    o_ref[...] = jnp.maximum(jnp.concatenate(outs, axis=1), 0.0)           # (TM, k*H)


# --------------------------------------------------------------------------------------
# Wrapper
# --------------------------------------------------------------------------------------
def _default_vmem_budget_bytes():
    """Physical VMEM minus headroom (v7x: 64 MiB/TC, v5e/v6e: 128 MiB)."""
    cap = None
    try:
        info = pltpu.get_tpu_info()
        cap = getattr(info, "vmem_capacity_bytes", None)
    except Exception:
        cap = None
    if not cap:
        cap = 64 << 20                      # conservative (v7x per-TC)
    return int(min(cap * 6 // 10, 96 << 20))  # ~40% headroom for compiler scratch


def _round_up(n, m):
    return ((n + m - 1) // m) * m


def planetoid_gat_forward(x, adj, params, *, row_tile=None, vmem_budget_bytes=None):
    """x: (N, Fin) f32; adj: (N, N) f32 dense mask (nonzeros = edges); params: per-head weights."""
    w, b, wa1, ba1, wa2, ba2 = params
    k_heads, H, Fin = w.shape
    N = x.shape[0]
    KH = k_heads * H
    K2 = 2 * k_heads
    f32 = 4
    hi = jax.lax.Precision.HIGHEST

    if vmem_budget_bytes is None:
        vmem_budget_bytes = _default_vmem_budget_bytes()
    vmem_limit = int(max(32 << 20, min(vmem_budget_bytes, 100 << 20)))

    # ---- parameter folding in the wrapper (tiny layout/precompute plumbing) ----
    # Columns [h*H, (h+1)*H) of w_all are w[h].T  -> one 256-wide head-fused matmul.
    w_all = jnp.transpose(w, (2, 0, 1)).reshape(Fin, KH)                   # (Fin, k*H)
    b_all = b[:, 0, :].reshape(1, KH)                                      # (1, k*H)
    # a_i(layer(x)) = x @ (W.T @ wa_i.T) + (b @ wa_i.T + ba_i)
    wa_all = jnp.concatenate(
        [jnp.einsum("khf,kh->fk", w, wa1[:, 0, :], precision=hi),
         jnp.einsum("khf,kh->fk", w, wa2[:, 0, :], precision=hi)], axis=1)  # (Fin, 2k)
    ba_all = jnp.concatenate(
        [jnp.einsum("kh,kh->k", b[:, 0, :], wa1[:, 0, :], precision=hi) + ba1[:, 0, 0],
         jnp.einsum("kh,kh->k", b[:, 0, :], wa2[:, 0, :], precision=hi) + ba2[:, 0, 0]]
    )[None, :]                                                             # (1, 2k)

    # ---- row-tile choice + padding (handles N with no nice divisor) ----
    def ws_b(tm, npad):   # Kernel B f32/int8 working-set estimate
        return (2 * tm * npad                                  # int8 adj stripe (double-buffered)
                + f32 * (3 * tm * npad                         # s / p working slabs
                         + 2 * npad * KH                       # resident feats (+ pipeline copy)
                         + 2 * tm * KH                         # output tile
                         + 2 * k_heads * (tm + npad)))         # a_1 / a_2 slabs

    if row_tile is not None:
        assert row_tile % 128 == 0, "row_tile must be a multiple of 128"
        tm = row_tile
        Npad = _round_up(max(N, tm), tm)
    else:
        cap = _round_up(N, 128)
        tm, Npad = 128, _round_up(max(N, 128), 128)
        for cand in (1024, 512, 256, 128):
            if cand <= cap:
                npad = _round_up(N, cand)
                if ws_b(cand, npad) <= vmem_budget_bytes:
                    tm, Npad = cand, npad
                    break

    # Pad inputs; padded rows/cols are structurally masked (adj == 0) and sliced off.
    x_p = jnp.pad(x.astype(jnp.float32), ((0, Npad - N), (0, 0)))
    adj_i8 = jnp.pad((adj != 0).astype(jnp.int8), ((0, Npad - N), (0, Npad - N)))

    # -------------------- Kernel A: head-fused projection --------------------
    def ws_a(tm_):
        return f32 * (2 * tm_ * Fin + 2 * tm_ * KH + 2 * tm_ * K2
                      + Fin * KH + Fin * K2 + KH + K2)

    tm_a = tm
    while ws_a(tm_a) > vmem_budget_bytes and tm_a % 16 == 0 and tm_a > 8:
        tm_a //= 2
    assert Npad % tm_a == 0

    feats, scores = pl.pallas_call(
        gat_projection_kernel,
        out_shape=(jax.ShapeDtypeStruct((Npad, KH), jnp.float32),
                   jax.ShapeDtypeStruct((Npad, K2), jnp.float32)),
        grid_spec=pltpu.PrefetchScalarGridSpec(
            num_scalar_prefetch=0,
            grid=(Npad // tm_a,),
            in_specs=[
                pl.BlockSpec((tm_a, Fin), lambda i: (i, 0)),      # x row tile
                pl.BlockSpec((Fin, KH), lambda i: (0, 0)),        # fused weights (resident)
                pl.BlockSpec((1, KH), lambda i: (0, 0)),          # fused bias
                pl.BlockSpec((Fin, K2), lambda i: (0, 0)),        # folded a_1/a_2 weights
                pl.BlockSpec((1, K2), lambda i: (0, 0)),          # folded a_1/a_2 biases
            ],
            out_specs=[
                pl.BlockSpec((tm_a, KH), lambda i: (i, 0)),       # feats (lane-dense k*H)
                pl.BlockSpec((tm_a, K2), lambda i: (i, 0)),       # [a_1 | a_2] scores
            ]),
        compiler_params=pltpu.CompilerParams(
            dimension_semantics=("parallel",),
            vmem_limit_bytes=vmem_limit),
    )(x_p, w_all, b_all, wa_all, ba_all)

    # a_1 sublane-major per head: (k, Npad, 1); a_2 lane-major per head: (k, 1, Npad)
    a1 = scores[:, :k_heads].T.reshape(k_heads, Npad, 1)
    a2 = scores[:, k_heads:].T.reshape(k_heads, 1, Npad)

    # -------------------- Kernel B: fused-head masked softmax + attn @ feats ------------
    attn_kernel = functools.partial(gat_attention_kernel, k_heads=k_heads, head_dim=H)
    out_p = pl.pallas_call(
        attn_kernel,
        out_shape=jax.ShapeDtypeStruct((Npad, KH), jnp.float32),
        grid_spec=pltpu.PrefetchScalarGridSpec(
            num_scalar_prefetch=0,
            grid=(Npad // tm,),
            in_specs=[
                pl.BlockSpec((tm, Npad), lambda ri: (ri, 0)),            # int8 adj row stripe
                pl.BlockSpec((k_heads, tm, 1), lambda ri: (0, ri, 0)),   # a_1 (sublane-major)
                pl.BlockSpec((k_heads, 1, Npad), lambda ri: (0, 0, 0)),  # a_2 (lane-major, resident)
                pl.BlockSpec((Npad, KH), lambda ri: (0, 0)),             # feats, all heads, resident
            ],
            out_specs=pl.BlockSpec((tm, KH), lambda ri: (ri, 0)),        # lane-dense (TM, k*H)
        ),
        compiler_params=pltpu.CompilerParams(
            dimension_semantics=("parallel",),
            vmem_limit_bytes=vmem_limit),
    )(adj_i8, a1, a2, feats)

    return out_p[:N]


# --------------------------------------------------------------------------------------
# Pure-JAX reference mirroring the PyTorch forward (dense-masked sparse softmax)
# --------------------------------------------------------------------------------------
def reference_forward(x, adj, params):
    w, b, wa1, ba1, wa2, ba2 = params
    hi = jax.lax.Precision.HIGHEST
    outs = []
    for h in range(w.shape[0]):
        feats = jnp.dot(x, w[h].T, precision=hi) + b[h]
        a1 = jnp.dot(feats, wa1[h].T, precision=hi) + ba1[h]
        a2 = jnp.dot(feats, wa2[h].T, precision=hi) + ba2[h]
        s = a1 + a2.T
        s = jnp.where(s >= 0.0, s, 0.01 * s)
        mask = adj != 0.0
        s_m = jnp.where(mask, s, -jnp.inf)
        m = jnp.max(s_m, axis=1, keepdims=True)
        p = jnp.where(mask, jnp.exp(s - m), 0.0)
        attn = p / jnp.sum(p, axis=1, keepdims=True)
        outs.append(jnp.dot(attn, feats, precision=hi))
    return jax.nn.relu(jnp.concatenate(outs, axis=1))


if __name__ == "__main__":
    # Small shapes consistent with PlanetoidGAT(input_size, output_size, k_heads):
    #   N nodes = 300 (NOT a multiple of 128 -> exercises the padding path),
    #   input_size = 64, output_size = 256, k_heads = 2
    #   -> per-head hidden H = output_size // k_heads = 128
    #   (f_size = output_size // 2 = 128 is divisible by k_heads, so the module assert holds)
    N, Fin, out_size, k_heads = 300, 64, 256, 2
    H = out_size // k_heads

    key = jax.random.PRNGKey(0)
    ks = jax.random.split(key, 9)

    x = jax.random.normal(ks[0], (N, Fin), jnp.float32)

    # Deterministic sparse Laplacian-like mask (~5% density + self loops so every row
    # has at least one nonzero, matching a typical graph Laplacian).
    edges = jax.random.uniform(ks[1], (N, N)) < 0.05
    adj = (edges | jnp.eye(N, dtype=bool)).astype(jnp.float32)

    # Deterministic synthetic parameters (same shapes as the PyTorch nn.Linear layers).
    w = jax.random.normal(ks[2], (k_heads, H, Fin), jnp.float32) / jnp.sqrt(Fin)
    b = jax.random.normal(ks[3], (k_heads, 1, H), jnp.float32) * 0.1
    wa1 = jax.random.normal(ks[4], (k_heads, 1, H), jnp.float32) / jnp.sqrt(H)
    ba1 = jax.random.normal(ks[5], (k_heads, 1, 1), jnp.float32) * 0.1
    wa2 = jax.random.normal(ks[6], (k_heads, 1, H), jnp.float32) / jnp.sqrt(H)
    ba2 = jax.random.normal(ks[7], (k_heads, 1, 1), jnp.float32) * 0.1
    params = (w, b, wa1, ba1, wa2, ba2)

    # row_tile=128 -> Npad=384, 3 pipelined row stripes (exercises tiling + padding).
    out = planetoid_gat_forward(x, adj, params, row_tile=128)
    out = jax.block_until_ready(out)

    ref = reference_forward(x, adj, params)
    assert out.shape == (N, out_size)
    assert np.allclose(np.asarray(out), np.asarray(ref), atol=2e-4, rtol=2e-4)

    print("KERNEL_OK")
</pallas_src>

<mosaic_0001>
module attributes {stable_mosaic.version = 11 : i64} {
  func.func @gat_projection_kernel(%arg0: i32, %arg1: memref<128x64xf32, #tpu.memory_space<vmem>>, %arg2: memref<64x256xf32, #tpu.memory_space<vmem>>, %arg3: memref<1x256xf32, #tpu.memory_space<vmem>>, %arg4: memref<64x4xf32, #tpu.memory_space<vmem>>, %arg5: memref<1x4xf32, #tpu.memory_space<vmem>>, %arg6: memref<128x256xf32, #tpu.memory_space<vmem>>, %arg7: memref<128x4xf32, #tpu.memory_space<vmem>>) attributes {dimension_semantics = [#tpu.dimension_semantics<parallel>], iteration_bounds = array<i64: 3>, scalar_prefetch = 0 : i64, scratch_operands = 0 : i64, tpu.core_type = #tpu.core_type<tc>, window_params = [{transform_indices = @transform_0, window_bounds = array<i64: 128, 64>}, {pipeline_mode = #tpu.pipeline_mode<synchronous>, transform_indices = @transform_1, window_bounds = array<i64: 64, 256>}, {pipeline_mode = #tpu.pipeline_mode<synchronous>, transform_indices = @transform_2, window_bounds = array<i64: 1, 256>}, {pipeline_mode = #tpu.pipeline_mode<synchronous>, transform_indices = @transform_3, window_bounds = array<i64: 64, 4>}, {pipeline_mode = #tpu.pipeline_mode<synchronous>, transform_indices = @transform_4, window_bounds = array<i64: 1, 4>}, {transform_indices = @transform_5, window_bounds = array<i64: 128, 256>}, {transform_indices = @transform_6, window_bounds = array<i64: 128, 4>}]} {
    %c0 = arith.constant 0 : index
    %c0_0 = arith.constant 0 : index
    %0 = vector.load %arg1[%c0, %c0_0] : memref<128x64xf32, #tpu.memory_space<vmem>>, vector<128x64xf32>
    %c0_1 = arith.constant 0 : index
    %c0_2 = arith.constant 0 : index
    %1 = vector.load %arg2[%c0_1, %c0_2] : memref<64x256xf32, #tpu.memory_space<vmem>>, vector<64x256xf32>
    %cst = arith.constant dense<0.000000e+00> : vector<128x256xf32>
    %2 = tpu.matmul %0, %1, %cst {dimension_numbers = #tpu.dot_dimension_numbers<[1], [0], [0], [1], [0, 0, 1, 1], [], []>} : vector<128x64xf32>, vector<64x256xf32>, vector<128x256xf32> -> vector<128x256xf32>
    %c0_3 = arith.constant 0 : index
    %c0_4 = arith.constant 0 : index
    %3 = vector.load %arg3[%c0_3, %c0_4] : memref<1x256xf32, #tpu.memory_space<vmem>>, vector<1x256xf32>
    %4 = vector.broadcast %3 : vector<1x256xf32> to vector<128x256xf32>
    %5 = arith.addf %2, %4 : vector<128x256xf32>
    %c0_5 = arith.constant 0 : index
    %c0_6 = arith.constant 0 : index
    %6 = vector.load %arg6[%c0_5, %c0_6] : memref<128x256xf32, #tpu.memory_space<vmem>>, vector<128x256xf32>
    tpu.vector_store %arg6[%c0_5, %c0_6], %5 {strides = array<i32>} : memref<128x256xf32, #tpu.memory_space<vmem>>, vector<128x256xf32>,
    %c0_7 = arith.constant 0 : index
    %c0_8 = arith.constant 0 : index
    %7 = vector.load %arg4[%c0_7, %c0_8] : memref<64x4xf32, #tpu.memory_space<vmem>>, vector<64x4xf32>
    %cst_9 = arith.constant dense<0.000000e+00> : vector<128x4xf32>
    %8 = tpu.matmul %0, %7, %cst_9 {dimension_numbers = #tpu.dot_dimension_numbers<[1], [0], [0], [1], [0, 0, 1, 1], [], []>} : vector<128x64xf32>, vector<64x4xf32>, vector<128x4xf32> -> vector<128x4xf32>
    %c0_10 = arith.constant 0 : index
    %c0_11 = arith.constant 0 : index
    %9 = vector.load %arg5[%c0_10, %c0_11] : memref<1x4xf32, #tpu.memory_space<vmem>>, vector<1x4xf32>
    %10 = vector.broadcast %9 : vector<1x4xf32> to vector<128x4xf32>
    %11 = arith.addf %8, %10 : vector<128x4xf32>
    %c0_12 = arith.constant 0 : index
    %c0_13 = arith.constant 0 : index
    %12 = vector.load %arg7[%c0_12, %c0_13] : memref<128x4xf32, #tpu.memory_space<vmem>>, vector<128x4xf32>
    tpu.vector_store %arg7[%c0_12, %c0_13], %11 {strides = array<i32>} : memref<128x4xf32, #tpu.memory_space<vmem>>, vector<128x4xf32>,
    return
  }
  func.func @transform_0(%arg0: i32) -> (i32, i32) {
    %c0_i32 = arith.constant 0 : i32
    %c0_i32_0 = arith.constant 0 : i32
    return %arg0, %c0_i32 : i32, i32
  }
  func.func @transform_1(%arg0: i32) -> (i32, i32) {
    %c0_i32 = arith.constant 0 : i32
    %c0_i32_0 = arith.constant 0 : i32
    %c0_i32_1 = arith.constant 0 : i32
    return %c0_i32, %c0_i32_0 : i32, i32
  }
  func.func @transform_2(%arg0: i32) -> (i32, i32) {
    %c0_i32 = arith.constant 0 : i32
    %c0_i32_0 = arith.constant 0 : i32
    %c0_i32_1 = arith.constant 0 : i32
    return %c0_i32, %c0_i32_0 : i32, i32
  }
  func.func @transform_3(%arg0: i32) -> (i32, i32) {
    %c0_i32 = arith.constant 0 : i32
    %c0_i32_0 = arith.constant 0 : i32
    %c0_i32_1 = arith.constant 0 : i32
    return %c0_i32, %c0_i32_0 : i32, i32
  }
  func.func @transform_4(%arg0: i32) -> (i32, i32) {
    %c0_i32 = arith.constant 0 : i32
    %c0_i32_0 = arith.constant 0 : i32
    %c0_i32_1 = arith.constant 0 : i32
    return %c0_i32, %c0_i32_0 : i32, i32
  }
  func.func @transform_5(%arg0: i32) -> (i32, i32) {
    %c0_i32 = arith.constant 0 : i32
    %c0_i32_0 = arith.constant 0 : i32
    return %arg0, %c0_i32 : i32, i32
  }
  func.func @transform_6(%arg0: i32) -> (i32, i32) {
    %c0_i32 = arith.constant 0 : i32
    %c0_i32_0 = arith.constant 0 : i32
    return %arg0, %c0_i32 : i32, i32
  }
}

</mosaic_0001>

<bundles_post_ra>
// kernel: tpu_custom_call.1
= control target key start
LH: loop header
LB: loop body
LE: loop exit
PB: predicated region body
PF: predicated region fallthrough
CT: control target
= control target key end

     0   :  { %12 = vsyncpa [#allocation3], 0  ;;  %s1533_s0 = inlined_call_operand.vmem [shape: f32[384,64], index: 0, kind: input, shape index: {}]   ;;  %s1534_s1 = inlined_call_operand.vmem [shape: f32[64,256], index: 1, kind: input, shape index: {}]   ;;  %s1535_s2 = inlined_call_operand.vmem [shape: f32[1,256], index: 2, kind: input, shape index: {}]   ;;  %s1536_s3 = inlined_call_operand.vmem [shape: f32[64,4], index: 3, kind: input, shape index: {}]   ;;  %s1537_s4 = inlined_call_operand.vmem [shape: f32[1,4], index: 4, kind: input, shape index: {}]   ;;  %s1538_s5 = inlined_call_operand.hbm [shape: f32[384,256], index: 5, kind: output, shape index: {0}]   ;;  %s1539_s6 = inlined_call_operand.vmem [shape: f32[384,4], index: 6, kind: output, shape index: {1}]  }
   0x1   :  { %14 = vsyncpa [#allocation3 + $0x1], 0  ;;  %s1140_s21 = smov 0   ;;  %s1142_s22 = smov 0  }
   0x2   :  { %s1144_s23 = smov 0   ;;  %s1146_s24 = smov 0  }
   0x3 LB: > { %s1161_s25 = sadd.s32 4294967295, %s1099_s24   ;;  %s841_s26 = sadd.s32 4294967294, %s1099_s24   ;;  %s1099_s24 = sphi %s1146_s24, %s1546_s24   ;;  %s1095_s23 = sphi %s1144_s23, %s1545_s23   ;;  %s1091_s22 = sphi %s1142_s22, %s1544_s22   ;;  %s1087_s21 = sphi %s1140_s21, %s1543_s21  }
   0x4   : > { %s1165_s27 = sadd.s32 1, %s1099_s24   ;;  %s137_s28 = sadd.s32 1, %s1095_s23 }
   0x5   : > { %s134_s29 = ssub.s32 %s1099_s24, %s1165_s27  ;;  %p147_p0 = scmp.ne.s32.totalorder %s1095_s23, %s1091_s22 }
   0x6   : > { %p135_p1 = scmp.eq.s32.totalorder %s134_s29, 0  ;;  %p148_p2 = scmp.eq.s32.totalorder %s1161_s25, 2 }
   0x7   : > { %p153_p3 = scmp.ne.s32.totalorder %s1091_s22, %s1087_s21  ;;  %p154_p4 = scmp.eq.s32.totalorder %s841_s26, 2 }
   0x8   : > { %s1176_s30 = scalar_select %p135_p1, %s1095_s23, %s137_s28  }
   0x9   : > { %p1178_p5 = por %p148_p2, %p147_p0  ;;  %p1182_p6 = por %p154_p4, %p153_p3 }
   0xa   : > { %p844_p7 = scmp.ge.s32.totalorder %s1099_s24, 1  ;;  %p219_p8 = scmp.lt.s32.totalorder %s1099_s24, 4 }
   0xc   : > { %p220_p9 = pnand %p844_p7, %p219_p8 }
   0xd   : > { %v284_v0 = vld [vmem:[%s1534_s1 + $0x8] sm:$0xff] (!%p220_p9)  ;;  %v286_v1 = vld [vmem:[%s1534_s1 + $0x18] sm:$0xff] (!%p220_p9)  ;;  %v283_v2 = vld [vmem:[%s1534_s1] sm:$0xff] (!%p220_p9)  ;;  %s846_s15 = sshll.u32 (!%p220_p9), %s1161_s25, 4  ;;  %v1101_v7 = vmov (!%p220_p9), 0.0   ;;  %vm311_vm0 = vcmask (!%p220_p9), 523264   ;;  %v301_v53 = vlaneseq (!%p220_p9) }
   0xe   : > { %223 = sbr.rel (%p220_p9) target bundleno = 306 (0x132), region = 40  ;;  %v955_v3 = vpack.c.bf16 (!%p220_p9), %v286_v1, %v284_v0  ;;  %v285_v4 = vld [vmem:[%s1534_s1 + $0x10] sm:$0xff] (!%p220_p9)  ;;  %v288_v5 = vld [vmem:[%s1534_s1 + $0x28] sm:$0xff] (!%p220_p9)  ;;  %v290_v6 = vld [vmem:[%s1534_s1 + $0x38] sm:$0xff] (!%p220_p9)  ;;  %424 = vmatprep.mubr.f32.mxu0 (!%p220_p9), %v1101_v7  ;;  %496 = vmatprep.mubr.f32.mxu1 (!%p220_p9), %v1101_v7  ;;  %p1218_p10 = scmp.lt.s32.totalorder (!%p220_p9), %s846_s15, 47  ;;  %vm713_vm1 = vcmask (!%p220_p9), 31744  }
   0xf   : > { %v957_v8 = vpack.c.bf16 (!%p220_p9), %v285_v4, %v283_v2  ;;  %v959_v9 = vpack.c.bf16 (!%p220_p9), %v290_v6, %v288_v5  ;;  %v287_v10 = vld [vmem:[%s1534_s1 + $0x20] sm:$0xff] (!%p220_p9)  ;;  %v289_v11 = vld [vmem:[%s1534_s1 + $0x30] sm:$0xff] (!%p220_p9)  ;;  %v292_v12 = vld [vmem:[%s1534_s1 + $0x48] sm:$0xff] (!%p220_p9)  ;;  %v302_v54 = vshrl.u32 (!%p220_p9), %v301_v53, 7  ;;  %s1102_s9 = smov (!%p220_p9), [#allocation2]  }
  0x10   : > { %956 = vmatprep.subr.bf16.mxu0 (!%p220_p9), %v955_v3  ;;  %987 = vmatprep.subr.bf16.mxu1 (!%p220_p9), %v955_v3  ;;  %v294_v13 = vld [vmem:[%s1534_s1 + $0x58] sm:$0xff] (!%p220_p9)  ;;  %v961_v14 = vpack.c.bf16 (!%p220_p9), %v289_v11, %v287_v10  ;;  %v291_v16 = vld [vmem:[%s1534_s1 + $0x40] sm:$0xff] (!%p220_p9)  ;;  %v293_v17 = vld [vmem:[%s1534_s1 + $0x50] sm:$0xff] (!%p220_p9) }
  0x11   : > { %958 = vmatpush1.bf16.msra.mxu0 (!%p220_p9), %v957_v8  ;;  %991 = vmatpush1.bf16.msra.mxu1 (!%p220_p9), %v957_v8  ;;  %v963_v15 = vpack.c.bf16 (!%p220_p9), %v294_v13, %v292_v12  ;;  %v296_v18 = vld [vmem:[%s1534_s1 + $0x68] sm:$0xff] (!%p220_p9)  ;;  %v298_v19 = vld [vmem:[%s1534_s1 + $0x78] sm:$0xff] (!%p220_p9)  ;;  %v965_v20 = vpack.c.bf16 (!%p220_p9), %v293_v17, %v291_v16  ;;  %v295_v22 = vld [vmem:[%s1534_s1 + $0x60] sm:$0xff] (!%p220_p9)  ;;  %v303_v55 = vsub.s32 (!%p220_p9), 0, %v302_v54  ;;  %v307_v57 = vsub.s32 (!%p220_p9), 1, %v302_v54 }
  0x12   : > { %960 = vmatprep.subr.bf16.mxu0 (!%p220_p9), %v959_v9  ;;  %988 = vmatprep.subr.bf16.mxu1 (!%p220_p9), %v959_v9  ;;  %v967_v21 = vpack.c.bf16 (!%p220_p9), %v298_v19, %v296_v18  ;;  %v297_v23 = vld [vmem:[%s1534_s1 + $0x70] sm:$0xff] (!%p220_p9)  ;;  %v553_v24 = vld [vmem:[%s1536_s3] sm:$0xff] (!%p220_p9)  ;;  %v554_v25 = vld [vmem:[%s1536_s3 + $0x8] sm:$0xff] (!%p220_p9) }
  0x13   : > { %v969_v26 = vpack.c.bf16 (!%p220_p9), %v297_v23, %v295_v22  ;;  %v971_v27 = vpack.c.bf16 (!%p220_p9), %v554_v25, %v553_v24  ;;  %v555_v28 = vld [vmem:[%s1536_s3 + $0x10] sm:$0xff] (!%p220_p9)  ;;  %v556_v29 = vld [vmem:[%s1536_s3 + $0x18] sm:$0xff] (!%p220_p9)  ;;  %v557_v33 = vld [vmem:[%s1536_s3 + $0x20] sm:$0xff] (!%p220_p9) }
  0x14   : > { %v975_v32 = vpack.c.bf16 (!%p220_p9), %v556_v29, %v555_v28  ;;  %v558_v34 = vld [vmem:[%s1536_s3 + $0x28] sm:$0xff] (!%p220_p9)  ;;  %v559_v38 = vld [vmem:[%s1536_s3 + $0x30] sm:$0xff] (!%p220_p9)  ;;  %v560_v39 = vld [vmem:[%s1536_s3 + $0x38] sm:$0xff] (!%p220_p9) }
  0x15   : > { %s1548_s15 = smov (!%p1218_p10, %s846_s15), 47  ;;  %962 = vmatpush1.bf16.msra.mxu0 %v961_v14  ;;  %992 = vmatpush1.bf16.msra.mxu1 %v961_v14  ;;  %v979_v37 = vpack.c.bf16 %v558_v34, %v557_v33  ;;  %v983_v42 = vpack.c.bf16 %v560_v39, %v559_v38  ;;  %v299_v56 = vld [vmem:[%s1535_s2] sm:$0x3] }
  0x16   : > { %964 = vmatprep.subr.bf16.mxu0 %v963_v15  ;;  %989 = vmatprep.subr.bf16.mxu1 %v963_v15  ;;  %s847_s16 = sshll.u32 %s1548_s15, 3  ;;  %v1351_v58 = vrot.slane %v299_v56, %v303_v55  ;;  %v1353_v59 = vrot.slane %v299_v56, %v307_v57  ;;  %v1388_v28 = vld [vmem:[%s1537_s4] ss:$0 sm:$0xff]  ;;  %s890_s15 = sshll.u32 %s1161_s25, 12 }
  0x17   : > { %s1259_s28 = scalar_lea.vmem %s1533_s0, %s847_s16  ;;  %s1399_s18 = scalar_lea.vmem %s1539_s6, %s847_s16 }
  0x18   : > { %v267_v30 = vld [vmem:[%s1259_s28] sm:$0xff]  ;;  %v268_v35 = vld [vmem:[%s1259_s28 + $0x8] sm:$0xff]  ;;  %v269_v40 = vld [vmem:[%s1259_s28 + $0x10] sm:$0xff]  ;;  %s1478_s20 = scalar_lea.hbm %s1538_s5, %s890_s15 }
  0x19   : > { %966 = vmatpush1.bf16.msra.mxu0 %v965_v20  ;;  %993 = vmatpush1.bf16.msra.mxu1 %v965_v20  ;;  %v1269_v31 = vld [vmem:[%s1259_s28 + $0x60] sm:$0xff]  ;;  %v280_v36 = vld [vmem:[%s1259_s28 + $0x68] sm:$0xff]  ;;  %v281_v41 = vld [vmem:[%s1259_s28 + $0x70] sm:$0xff] }
  0x1a   : > { %968 = vmatprep.subr.bf16.mxu0 %v967_v21  ;;  %990 = vmatprep.subr.bf16.mxu1 %v967_v21  ;;  %v270_v43 = vld [vmem:[%s1259_s28 + $0x18] sm:$0xff]  ;;  %v271_v45 = vld [vmem:[%s1259_s28 + $0x20] sm:$0xff]  ;;  %v272_v46 = vld [vmem:[%s1259_s28 + $0x28] sm:$0xff] }
  0x1b   : > { %v282_v44 = vld [vmem:[%s1259_s28 + $0x78] sm:$0xff]  ;;  %v273_v47 = vld [vmem:[%s1259_s28 + $0x30] sm:$0xff]  ;;  %v275_v49 = vld [vmem:[%s1259_s28 + $0x40] sm:$0xff] }
  0x1c   : > { %v274_v48 = vld [vmem:[%s1259_s28 + $0x38] sm:$0xff]  ;;  %v276_v50 = vld [vmem:[%s1259_s28 + $0x48] sm:$0xff]  ;;  %v277_v51 = vld [vmem:[%s1259_s28 + $0x50] sm:$0xff] }
  0x1d   : > { %970 = vmatpush1.bf16.msra.mxu0 %v969_v26  ;;  %994 = vmatpush1.bf16.msra.mxu1 %v969_v26  ;;  %v278_v52 = vld [vmem:[%s1259_s28 + $0x58] sm:$0xff]  ;;  %s244_s28 = sand.u32 1, %s1091_s22  }
  0x1e   : > { %972 = vmatprep.subr.bf16.mxu1 %v971_v27  ;;  %s845_s10 = sshll.u32 %s244_s28, 8  ;;  %s1492_s26 = scalar_lea.sflag [#allocation3], %s244_s28 }
  0x1f   : > { %s1359_s11 = scalar_lea.vmem [#allocation2], %s845_s10  ;;  %s1041_s10 = sshll.u32 %s1102_s9, 4  ;;  %s1042_s10 = int_to_ptr.vmem [resolvable:$false] %s1041_s10 }
  0x20   : > { %850 = vmatmul.mubr.msk.f32.vlgmr.msra.gmra.mrb[0].mxu0 %vm311_vm0, %v267_v30  ;;  %862 = vmatmul.mubr.msk.f32.vlgmr.msra.gmra.mrb[0].mxu1 %vm311_vm0, %v1269_v31  ;;  %s750_s16 = sshll.u32 %s1359_s11, 4  ;;  %s1043_s12 = scalar_lea.vmem %s1042_s10, 8192  ;;  %s1480_s16 = int_to_ptr.vmem [resolvable:$true] %s750_s16 }
  0x21   : > { %974 = vmatpush3.bf16.msra.mxu1 %v971_v27  ;;  %430 = vmatprep.mubr.f32.mxu0 %v1101_v7  ;;  %s1037_s29 = scalar_lea.vmem %s1480_s16, 4096  ;;  %p1044_p0 = scmp.lt.s32.totalorder %s1480_s16, %s1042_s10 }
  0x22   : > { %502 = vmatprep.mubr.f32.mxu1 %v1101_v7  ;;  %976 = vmatprep.subr.bf16.mxu1 %v975_v32  ;;  %p1038_p11 = scmp.ne.s32.totalorder %s1480_s16, %s1037_s29  ;;  %p1045_p1 = scmp.lt.s32.totalorder %s1043_s12, %s1037_s29 }
  0x24   : > { %851 = vmatmul.mubr.msk.f32.gmra.mrb[2].mxu0 %vm311_vm0, %v268_v35  ;;  %863 = vmatmul.mubr.msk.f32.gmra.mrb[2].mxu1 %vm311_vm0, %v280_v36  ;;  %p1039_p12 = pnand %p1038_p11, %p1178_p5  ;;  %p1046_p2 = por %p1045_p1, %p1044_p0 }
  0x25   : > { %978 = vmatpush3.bf16.msra.mxu1 %v975_v32  ;;  %436 = vmatprep.mubr.f32.mxu0 %v1101_v7 }
  0x26   : > { %508 = vmatprep.mubr.f32.mxu1 %v1101_v7  ;;  %980 = vmatprep.subr.bf16.mxu1 %v979_v37  ;;  %p1040_p13 = pneg %p1039_p12 }
  0x28   : > { %852 = vmatmul.mubr.msk.f32.gmra.mrb[4].mxu0 %vm311_vm0, %v269_v40  ;;  %864 = vmatmul.mubr.msk.f32.gmra.mrb[4].mxu1 %vm311_vm0, %v281_v41  ;;  %p1047_p3 = pnand %p1046_p2, %p1040_p13 }
  0x29   : > { %982 = vmatpush3.bf16.msra.mxu1 %v979_v37  ;;  %442 = vmatprep.mubr.f32.mxu0 %v1101_v7 }
  0x2a   : > { %514 = vmatprep.mubr.f32.mxu1 %v1101_v7  ;;  %984 = vmatprep.subr.bf16.mxu1 %v983_v42 }
  0x2c   : > { %853 = vmatmul.mubr.msk.f32.gmra.mrb[6].mxu0 %vm311_vm0, %v270_v43  ;;  %865 = vmatmul.mubr.msk.f32.gmra.mrb[6].mxu1 %vm311_vm0, %v282_v44 }
  0x2d   : > { %986 = vmatpush3.bf16.msra.mxu1 %v983_v42  ;;  %448 = vmatprep.mubr.f32.mxu0 %v1101_v7 }
  0x2e   : > { %931 = vmatprep.mubr.msk.f32.mxu1 %vm311_vm0, %v267_v30 }
  0x30   : > { %854 = vmatmul.mubr.msk.f32.gmra.mrb[8].mxu0 %vm311_vm0, %v271_v45  ;;  %932 = vmatmul.mubr.msk.f32.vlgmr.msra.gmra.mrb[8].mxu1 %vm311_vm0, %v268_v35 }
  0x31   : > { %454 = vmatprep.mubr.f32.mxu0 %v1101_v7  ;;  %934 = vmatprep.mubr.msk.f32.mxu1 %vm311_vm0, %v269_v40 }
  0x34   : > { %855 = vmatmul.mubr.msk.f32.gmra.mrb[10].mxu0 %vm311_vm0, %v272_v46  ;;  %935 = vmatmul.mubr.msk.f32.gmra.mrb[10].mxu1 %vm311_vm0, %v270_v43 }
  0x35   : > { %460 = vmatprep.mubr.f32.mxu0 %v1101_v7  ;;  %937 = vmatprep.mubr.msk.f32.mxu1 %vm311_vm0, %v271_v45 }
  0x38   : > { %856 = vmatmul.mubr.msk.f32.gmra.mrb[12].mxu0 %vm311_vm0, %v273_v47  ;;  %938 = vmatmul.mubr.msk.f32.gmra.mrb[12].mxu1 %vm311_vm0, %v272_v46 }
  0x39   : > { %466 = vmatprep.mubr.f32.mxu0 %v1101_v7  ;;  %940 = vmatprep.mubr.msk.f32.mxu1 %vm311_vm0, %v273_v47 }
  0x3c   : > { %857 = vmatmul.mubr.msk.f32.gmra.mrb[14].mxu0 %vm311_vm0, %v274_v48  ;;  %941 = vmatmul.mubr.msk.f32.gmra.mrb[14].mxu1 %vm311_vm0, %v274_v48 }
  0x3d   : > { %472 = vmatprep.mubr.f32.mxu0 %v1101_v7  ;;  %943 = vmatprep.mubr.msk.f32.mxu1 %vm311_vm0, %v275_v49 }
  0x40   : > { %858 = vmatmul.mubr.msk.f32.gmra.mrb[16].mxu0 %vm311_vm0, %v275_v49  ;;  %944 = vmatmul.mubr.msk.f32.gmra.mrb[16].mxu1 %vm311_vm0, %v276_v50 }
  0x41   : > { %478 = vmatprep.mubr.f32.mxu0 %v1101_v7  ;;  %946 = vmatprep.mubr.msk.f32.mxu1 %vm311_vm0, %v277_v51 }
  0x44   : > { %859 = vmatmul.mubr.msk.f32.gmra.mrb[18].mxu0 %vm311_vm0, %v276_v50  ;;  %947 = vmatmul.mubr.msk.f32.gmra.mrb[18].mxu1 %vm311_vm0, %v278_v52 }
  0x45   : > { %484 = vmatprep.mubr.f32.mxu0 %v1101_v7  ;;  %949 = vmatprep.mubr.msk.f32.mxu1 %vm311_vm0, %v1269_v31 }
  0x48   : > { %860 = vmatmul.mubr.msk.f32.gmra.mrb[20].mxu0 %vm311_vm0, %v277_v51  ;;  %950 = vmatmul.mubr.msk.f32.gmra.mrb[20].mxu1 %vm311_vm0, %v280_v36 }
  0x49   : > { %490 = vmatprep.mubr.f32.mxu0 %v1101_v7  ;;  %952 = vmatprep.mubr.msk.f32.mxu1 %vm311_vm0, %v281_v41 }
  0x4c   : > { %861 = vmatmul.mubr.msk.f32.gmra.mrb[22].mxu0 %vm311_vm0, %v278_v52  ;;  %953 = vmatmul.mubr.msk.f32.gmra.mrb[22].mxu1 %vm311_vm0, %v282_v44 }
  0xf3   : > { %v426_v60 = vpop.f32.mrb[0].mxu0  ;;  %v498_v61 = vpop.f32.mrb[0].mxu1 }
  0xf4   : > { %v427_v62 = vadd.f32 %v426_v60, %v1351_v58  ;;  %v499_v63 = vadd.f32 %v498_v61, %v1351_v58  ;;  %v428_v0 = vpop.f32.mrb[1].mxu0  ;;  %v500_v1 = vpop.f32.mrb[1].mxu1 }
  0xf5   : > { %v429_v2 = vadd.f32 %v428_v0, %v1353_v59  ;;  %v501_v3 = vadd.f32 %v500_v1, %v1353_v59 }
  0xf6   : > { %521 = vst [vmem:[%s1359_s11] sm:$0xff] %v427_v62  ;;  %545 = vst [vmem:[%s1359_s11 + $0xc0] sm:$0xff] %v499_v63 }
  0xf7   : > { %522 = vst [vmem:[%s1359_s11 + $0x8] sm:$0xff] %v429_v2  ;;  %546 = vst [vmem:[%s1359_s11 + $0xc8] sm:$0xff] %v501_v3  ;;  %v432_v4 = vpop.f32.mrb[2].mxu0  ;;  %v504_v5 = vpop.f32.mrb[2].mxu1 }
  0xf8   : > { %v433_v6 = vadd.f32 %v432_v4, %v1351_v58  ;;  %v505_v7 = vadd.f32 %v504_v5, %v1351_v58  ;;  %v434_v8 = vpop.f32.mrb[3].mxu0  ;;  %v506_v9 = vpop.f32.mrb[3].mxu1 }
  0xf9   : > { %v435_v10 = vadd.f32 %v434_v8, %v1353_v59  ;;  %v507_v11 = vadd.f32 %v506_v9, %v1353_v59 }
  0xfa   : > { %523 = vst [vmem:[%s1359_s11 + $0x10] sm:$0xff] %v433_v6  ;;  %547 = vst [vmem:[%s1359_s11 + $0xd0] sm:$0xff] %v505_v7 }
  0xfb   : > { %524 = vst [vmem:[%s1359_s11 + $0x18] sm:$0xff] %v435_v10  ;;  %548 = vst [vmem:[%s1359_s11 + $0xd8] sm:$0xff] %v507_v11  ;;  %v438_v12 = vpop.f32.mrb[4].mxu0  ;;  %v510_v13 = vpop.f32.mrb[4].mxu1 }
  0xfc   : > { %v439_v14 = vadd.f32 %v438_v12, %v1351_v58  ;;  %v511_v15 = vadd.f32 %v510_v13, %v1351_v58  ;;  %v440_v16 = vpop.f32.mrb[5].mxu0  ;;  %v512_v17 = vpop.f32.mrb[5].mxu1 }
  0xfd   : > { %v441_v18 = vadd.f32 %v440_v16, %v1353_v59  ;;  %v513_v19 = vadd.f32 %v512_v17, %v1353_v59 }
  0xfe   : > { %525 = vst [vmem:[%s1359_s11 + $0x20] sm:$0xff] %v439_v14  ;;  %549 = vst [vmem:[%s1359_s11 + $0xe0] sm:$0xff] %v511_v15 }
  0xff   : > { %526 = vst [vmem:[%s1359_s11 + $0x28] sm:$0xff] %v441_v18  ;;  %550 = vst [vmem:[%s1359_s11 + $0xe8] sm:$0xff] %v513_v19  ;;  %v444_v20 = vpop.f32.mrb[6].mxu0  ;;  %v516_v21 = vpop.f32.mrb[6].mxu1 }
 0x100   : > { %v445_v22 = vadd.f32 %v444_v20, %v1351_v58  ;;  %v517_v23 = vadd.f32 %v516_v21, %v1351_v58  ;;  %v446_v24 = vpop.f32.mrb[7].mxu0  ;;  %v518_v25 = vpop.f32.mrb[7].mxu1 }
 0x101   : > { %v447_v26 = vadd.f32 %v446_v24, %v1353_v59  ;;  %v519_v27 = vadd.f32 %v518_v25, %v1353_v59 }
 0x102   : > { %527 = vst [vmem:[%s1359_s11 + $0x30] sm:$0xff] %v445_v22  ;;  %551 = vst [vmem:[%s1359_s11 + $0xf0] sm:$0xff] %v517_v23 }
 0x103   : > { %528 = vst [vmem:[%s1359_s11 + $0x38] sm:$0xff] %v447_v26  ;;  %552 = vst [vmem:[%s1359_s11 + $0xf8] sm:$0xff] %v519_v27  ;;  %v450_v29 = vpop.f32.mrb[8].mxu0  ;;  %v933_v30 = vpop.f32.mrb[8].mxu1 }
 0x104   : > { %v451_v31 = vadd.f32 %v450_v29, %v1351_v58  ;;  %v640_v32 = vadd.f32 %v933_v30, %v1388_v28  ;;  %v452_v33 = vpop.f32.mrb[9].mxu0  ;;  %v634_v34 = vpop.f32.mrb[9].mxu1 }
 0x105   : > { %v453_v35 = vadd.f32 %v452_v33, %v1353_v59  ;;  %v635_v36 = vadd.f32 %v1388_v28, %v634_v34 }
 0x106   : > { %529 = vst [vmem:[%s1359_s11 + $0x40] sm:$0xff] %v451_v31  ;;  %715 = vst.msk [vmem:[%s1399_s18 + $0x8] sm:$0xff] %vm713_vm1, %v640_v32 }
 0x107   : > { %530 = vst [vmem:[%s1359_s11 + $0x48] sm:$0xff] %v453_v35  ;;  %714 = vst.msk [vmem:[%s1399_s18] sm:$0xff] %vm713_vm1, %v635_v36  ;;  %v456_v37 = vpop.f32.mrb[10].mxu0  ;;  %v936_v38 = vpop.f32.mrb[10].mxu1 }
 0x108   : > { %v457_v39 = vadd.f32 %v456_v37, %v1351_v58  ;;  %v650_v40 = vadd.f32 %v936_v38, %v1388_v28  ;;  %v458_v41 = vpop.f32.mrb[11].mxu0  ;;  %v644_v42 = vpop.f32.mrb[11].mxu1 }
 0x109   : > { %v459_v43 = vadd.f32 %v458_v41, %v1353_v59  ;;  %v645_v44 = vadd.f32 %v1388_v28, %v644_v42 }
 0x10a   : > { %531 = vst [vmem:[%s1359_s11 + $0x50] sm:$0xff] %v457_v39  ;;  %717 = vst.msk [vmem:[%s1399_s18 + $0x18] sm:$0xff] %vm713_vm1, %v650_v40 }
 0x10b   : > { %532 = vst [vmem:[%s1359_s11 + $0x58] sm:$0xff] %v459_v43  ;;  %716 = vst.msk [vmem:[%s1399_s18 + $0x10] sm:$0xff] %vm713_vm1, %v645_v44  ;;  %v462_v45 = vpop.f32.mrb[12].mxu0  ;;  %v939_v46 = vpop.f32.mrb[12].mxu1 }
 0x10c   : > { %v463_v47 = vadd.f32 %v462_v45, %v1351_v58  ;;  %v660_v48 = vadd.f32 %v939_v46, %v1388_v28  ;;  %v464_v49 = vpop.f32.mrb[13].mxu0  ;;  %v654_v50 = vpop.f32.mrb[13].mxu1 }
 0x10d   : > { %v465_v51 = vadd.f32 %v464_v49, %v1353_v59  ;;  %v655_v52 = vadd.f32 %v1388_v28, %v654_v50 }
 0x10e   : > { %533 = vst [vmem:[%s1359_s11 + $0x60] sm:$0xff] %v463_v47  ;;  %719 = vst.msk [vmem:[%s1399_s18 + $0x28] sm:$0xff] %vm713_vm1, %v660_v48 }
 0x10f   : > { %534 = vst [vmem:[%s1359_s11 + $0x68] sm:$0xff] %v465_v51  ;;  %718 = vst.msk [vmem:[%s1399_s18 + $0x20] sm:$0xff] %vm713_vm1, %v655_v52  ;;  %v468_v53 = vpop.f32.mrb[14].mxu0  ;;  %v942_v54 = vpop.f32.mrb[14].mxu1 }
 0x110   : > { %v469_v55 = vadd.f32 %v468_v53, %v1351_v58  ;;  %v670_v56 = vadd.f32 %v942_v54, %v1388_v28  ;;  %v470_v57 = vpop.f32.mrb[15].mxu0  ;;  %v664_v60 = vpop.f32.mrb[15].mxu1 }
 0x111   : > { %v471_v61 = vadd.f32 %v470_v57, %v1353_v59  ;;  %v665_v62 = vadd.f32 %v1388_v28, %v664_v60 }
 0x112   : > { %535 = vst [vmem:[%s1359_s11 + $0x70] sm:$0xff] %v469_v55  ;;  %721 = vst.msk [vmem:[%s1399_s18 + $0x38] sm:$0xff] %vm713_vm1, %v670_v56 }
 0x113   : > { %536 = vst [vmem:[%s1359_s11 + $0x78] sm:$0xff] %v471_v61  ;;  %720 = vst.msk [vmem:[%s1399_s18 + $0x30] sm:$0xff] %vm713_vm1, %v665_v62  ;;  %v474_v63 = vpop.f32.mrb[16].mxu0  ;;  %v945_v0 = vpop.f32.mrb[16].mxu1 }
 0x114   : > { %v475_v1 = vadd.f32 %v474_v63, %v1351_v58  ;;  %v680_v2 = vadd.f32 %v945_v0, %v1388_v28  ;;  %v476_v3 = vpop.f32.mrb[17].mxu0  ;;  %v674_v4 = vpop.f32.mrb[17].mxu1 }
 0x115   : > { %v477_v5 = vadd.f32 %v476_v3, %v1353_v59  ;;  %v675_v6 = vadd.f32 %v1388_v28, %v674_v4 }
 0x116   : > { %537 = vst [vmem:[%s1359_s11 + $0x80] sm:$0xff] %v475_v1  ;;  %723 = vst.msk [vmem:[%s1399_s18 + $0x48] sm:$0xff] %vm713_vm1, %v680_v2 }
 0x117   : > { %538 = vst [vmem:[%s1359_s11 + $0x88] sm:$0xff] %v477_v5  ;;  %722 = vst.msk [vmem:[%s1399_s18 + $0x40] sm:$0xff] %vm713_vm1, %v675_v6  ;;  %v480_v7 = vpop.f32.mrb[18].mxu0  ;;  %v948_v8 = vpop.f32.mrb[18].mxu1 }
 0x118   : > { %v481_v9 = vadd.f32 %v480_v7, %v1351_v58  ;;  %v690_v10 = vadd.f32 %v948_v8, %v1388_v28  ;;  %v482_v11 = vpop.f32.mrb[19].mxu0  ;;  %v684_v12 = vpop.f32.mrb[19].mxu1 }
 0x119   : > { %v483_v13 = vadd.f32 %v482_v11, %v1353_v59  ;;  %v685_v14 = vadd.f32 %v1388_v28, %v684_v12 }
 0x11a   : > { %539 = vst [vmem:[%s1359_s11 + $0x90] sm:$0xff] %v481_v9  ;;  %725 = vst.msk [vmem:[%s1399_s18 + $0x58] sm:$0xff] %vm713_vm1, %v690_v10 }
 0x11b   : > { %540 = vst [vmem:[%s1359_s11 + $0x98] sm:$0xff] %v483_v13  ;;  %724 = vst.msk [vmem:[%s1399_s18 + $0x50] sm:$0xff] %vm713_vm1, %v685_v14  ;;  %v486_v15 = vpop.f32.mrb[20].mxu0  ;;  %v951_v16 = vpop.f32.mrb[20].mxu1 }
 0x11c   : > { %v487_v17 = vadd.f32 %v486_v15, %v1351_v58  ;;  %v700_v18 = vadd.f32 %v951_v16, %v1388_v28  ;;  %v488_v19 = vpop.f32.mrb[21].mxu0  ;;  %v694_v20 = vpop.f32.mrb[21].mxu1 }
 0x11d   : > { %v489_v21 = vadd.f32 %v488_v19, %v1353_v59  ;;  %v695_v22 = vadd.f32 %v1388_v28, %v694_v20 }
 0x11e   : > { %541 = vst [vmem:[%s1359_s11 + $0xa0] sm:$0xff] %v487_v17  ;;  %727 = vst.msk [vmem:[%s1399_s18 + $0x68] sm:$0xff] %vm713_vm1, %v700_v18 }
 0x11f   : > { %542 = vst [vmem:[%s1359_s11 + $0xa8] sm:$0xff] %v489_v21  ;;  %726 = vst.msk [vmem:[%s1399_s18 + $0x60] sm:$0xff] %vm713_vm1, %v695_v22  ;;  %v492_v23 = vpop.f32.mrb[22].mxu0  ;;  %v954_v24 = vpop.f32.mrb[22].mxu1 }
 0x120   : > { %v493_v25 = vadd.f32 %v492_v23, %v1351_v58  ;;  %v710_v26 = vadd.f32 %v954_v24, %v1388_v28  ;;  %v494_v27 = vpop.f32.mrb[23].mxu0  ;;  %v704_v29 = vpop.f32.mrb[23].mxu1 }
 0x121   : > { %v495_v30 = vadd.f32 %v494_v27, %v1353_v59  ;;  %v705_v31 = vadd.f32 %v1388_v28, %v704_v29 }
 0x122   : > { %543 = vst [vmem:[%s1359_s11 + $0xb0] sm:$0xff] %v493_v25  ;;  %729 = vst.msk [vmem:[%s1399_s18 + $0x78] sm:$0xff] %vm713_vm1, %v710_v26 }
 0x123   : > { %544 = vst [vmem:[%s1359_s11 + $0xb8] sm:$0xff] %v495_v30  ;;  %728 = vst.msk [vmem:[%s1399_s18 + $0x70] sm:$0xff] %vm713_vm1, %v705_v31 }
 0x124   : > { %1050 = shalt.err (!%p1047_p3)
}
 0x125   : > { %s1051_s28 = scalar_lea.hbm %s1478_s20, 4096  ;;  %s1055_s13 = scalar_lea.hbm %s1538_s5, 12288 }
 0x126   : > { %p1052_p4 = scmp.ne.s32.totalorder %s1478_s20, %s1051_s28  ;;  %p1056_p9 = scmp.lt.u32.totalorder %s1478_s20, %s1538_s5 }
 0x127   : > { %p1057_p10 = scmp.lt.u32.totalorder %s1055_s13, %s1051_s28  ;;  %p1059_p12 = scmp.lt.u32.totalorder %s1051_s28, %s1478_s20 }
 0x128   : > { %p1053_p7 = pnand %p1052_p4, %p1178_p5 }
 0x129   : > { %p1058_p11 = por %p1057_p10, %p1056_p9 }
 0x12a   : > { %p1054_p8 = pneg %p1053_p7 }
 0x12b   : > { %p1060_p13 = por %p1059_p12, %p1058_p11 }
 0x12d   : > { %p1061_p0 = pnand %p1060_p13, %p1054_p8 }
 0x12f   : > { %1064 = shalt.err (!%p1061_p0)
}
 0x130   : > { %s1103_s15 = smov 256   ;;  %s1104_s25 = smov 16  }
 0x131   : > { %995 = dma.vmem_to_hbm [thread:$0]  (%p1178_p5), %s1480_s16, 4096, %s1478_s20, %s1492_s26, %s1103_s15, %s1103_s15, %s1104_s25  }
 0x132 PF: > { %p1001_p1 = scmp.ge.s32.totalorder %s1099_s24, 2  ;;  %s769_s19 = sand.u32 1, %s1087_s21  }
 0x133   : > { %s770_s29 = scalar_lea.sflag [#allocation3], %s769_s19 }
 0x134   : > { %p998_p2 = pnand %p1001_p1, %p1182_p6 }
 0x136   : > { %1082 = dma.done.wait (!%p998_p2), %s770_s29, 4096  }
 0x137   : > { %1084 = vsyncadd (!%p998_p2), %s770_s29, 4294963200  ;;  %p17_p3 = scmp.ge.s32.totalorder %s1165_s27, 5   ;;  %s1543_s21 = smov %s1091_s22 }
 0x138   : > { %s1544_s22 = smov %s1095_s23  ;;  %s1545_s23 = smov %s1176_s30 }
 0x139   : > { %s1546_s24 = smov %s1165_s27  ;;  %19 = sbr.rel (!%p17_p3) target bundleno = 3 (0x3), region = 87 }
 0x140   :  { %783 = vsyncpa [#allocation3], 1 }
 0x141   :  { %785 = vsyncpa [#allocation3 + $0x1], 1 }

</bundles_post_ra>
